<compile_context>
chip_gen: v7x
topology: tpu7x:2x2x1
jax: 0.10.0
libtpu: 0.0.40
codegen_flags: <defaults>
</compile_context>

<pallas_src>
import functools

import jax
import jax.numpy as jnp
from jax.experimental import pallas as pl
from jax.experimental.pallas import tpu as pltpu


def _accuracy_kernel(out_ref, tgt_ref, res_ref, count_ref, *, ks, batch):
    """One batch-tile step of top-k accuracy.

    out_ref:   (TB, C)   logits tile (native dtype)
    tgt_ref:   (TB, 1)   int32 target class indices
    res_ref:   (1, nres) float32 final accuracies (written on the last step)
    count_ref: (1, nres) int32 running correct counts (scratch accumulator)
    """
    step = pl.program_id(0)

    @pl.when(step == 0)
    def _():
        count_ref[...] = jnp.zeros_like(count_ref)

    # Upcast in-register: the HBM->VMEM DMA stays in the native dtype (mem-bound,
    # so the widen is free) and keeps the compare path f32 on v5e (no bf16 VPU).
    x = out_ref[...].astype(jnp.float32)                      # (TB, C)
    tgt = tgt_ref[...]                                        # (TB, 1) i32
    TB, C = x.shape
    nres = count_ref.shape[1]

    # Gather the score of the target class for each row via a one-hot mask.
    col = jax.lax.broadcasted_iota(jnp.int32, (TB, C), 1)
    tgt_score = jnp.max(jnp.where(col == tgt, x, -jnp.inf),
                        axis=1, keepdims=True)                # (TB, 1)

    # rank[i] = #{j : x[i, j] > x[i, target[i]]}   (int32: exact for any C)
    rank = jnp.sum((x > tgt_score).astype(jnp.int32),
                   axis=1, keepdims=True)                     # (TB, 1)

    # Mask rows that fall past the real batch (ragged last tile).
    row = jax.lax.broadcasted_iota(jnp.int32, (TB, 1), 0)
    valid = (step * TB + row) < batch                         # (TB, 1)

    # Build the per-k threshold row vector without a dense vector constant.
    kcol = jax.lax.broadcasted_iota(jnp.int32, (1, nres), 1)
    k_vec = jnp.zeros((1, nres), jnp.int32)
    for idx, k in enumerate(ks):
        k_vec = jnp.where(kcol == idx, jnp.int32(k), k_vec)   # (1, nres)

    # One vectorized hit matrix over all k's; single reduction; single store.
    hits = jnp.logical_and(rank < k_vec, valid)               # (TB, nres)
    count_ref[...] += jnp.sum(hits.astype(jnp.int32), axis=0, keepdims=True)

    @pl.when(step == pl.num_programs(0) - 1)
    def _():
        res_ref[...] = count_ref[...].astype(jnp.float32) * jnp.float32(1.0 / batch)


def accuracy_many(output, target, topk=(1,), block_rows=512):
    """Returns a list of shape-(1,) float32 arrays, one per k in `topk`."""
    B, C = output.shape
    nres = len(topk)
    tgt2d = target.astype(jnp.int32).reshape(B, 1)

    # Batch-tile sizing: multiple of 8, and keep one logits tile <= ~2 MiB so the
    # double-buffered pipeline stays well under v5e's 16 MiB / v7x's 32 MiB scoped VMEM.
    bytes_per_row = C * output.dtype.itemsize
    vmem_rows = max(8, (2 * 1024 * 1024) // max(bytes_per_row, 1))
    tb = min(block_rows, vmem_rows, B)
    tb = max(8, (tb // 8) * 8)
    if tb >= B:
        tb = B  # whole-array block shape is always legal, any B
    grid = (pl.cdiv(B, tb),)

    res = pl.pallas_call(
        functools.partial(
            _accuracy_kernel, ks=tuple(int(k) for k in topk), batch=B),
        out_shape=jax.ShapeDtypeStruct((1, nres), jnp.float32),
        grid_spec=pltpu.PrefetchScalarGridSpec(
            num_scalar_prefetch=0,
            grid=grid,
            in_specs=[
                pl.BlockSpec((tb, C), lambda i: (i, 0)),   # logits tile
                pl.BlockSpec((tb, 1), lambda i: (i, 0)),   # target tile
            ],
            out_specs=pl.BlockSpec((1, nres), lambda i: (0, 0)),
            scratch_shapes=[pltpu.VMEM((1, nres), jnp.int32)],
        ),
        compiler_params=pltpu.CompilerParams(
            # Single accumulator output resident across the batch axis.
            # TODO(synk): per-core partial counts would let v7x's 2 TCs split the batch.
            dimension_semantics=("arbitrary",),
        ),
    )(output, tgt2d)

    return [res[0, i:i + 1] for i in range(nres)]


def _reference_accuracy_many(output, target, topk=(1,)):
    """Pure-JAX reference mirroring the PyTorch module."""
    maxk = max(topk)
    batch = target.shape[0]
    _, pred = jax.lax.top_k(output.astype(jnp.float32), maxk)   # (B, maxk)
    pred = pred.T                                               # (maxk, B)
    correct = pred == target.reshape(1, -1)                     # (maxk, B)
    res = []
    for k in topk:
        correct_k = jnp.sum(correct[:k].astype(jnp.float32)).reshape(1)
        res.append(correct_k * (1.0 / batch))
    return res


if __name__ == "__main__":
    key = jax.random.PRNGKey(0)
    k_out, k_tgt = jax.random.split(key)

    B, C = 24, 128
    topk = (1, 5)

    output = jax.random.normal(k_out, (B, C), dtype=jnp.float32)
    target = jax.random.randint(k_tgt, (B,), 0, C, dtype=jnp.int32)

    # Small block_rows so the demo exercises the multi-step batch pipeline (grid=(3,)).
    res = accuracy_many(output, target, topk=topk, block_rows=8)
    res = [jax.block_until_ready(r) for r in res]

    ref = _reference_accuracy_many(output, target, topk=topk)
    for r, rr in zip(res, ref):
        assert r.shape == (1,)
        assert jnp.allclose(r, rr), (r, rr)

    print("KERNEL_OK")
</pallas_src>

<mosaic_0001>
module attributes {stable_mosaic.version = 11 : i64} {
  func.func @_accuracy_kernel(%arg0: i32, %arg1: memref<8x128xf32, #tpu.memory_space<vmem>>, %arg2: memref<8x1xi32, #tpu.memory_space<vmem>>, %arg3: memref<1x2xf32, #tpu.memory_space<vmem>>, %arg4: memref<1x2xi32, #tpu.memory_space<vmem>>) attributes {dimension_semantics = [#tpu.dimension_semantics<arbitrary>], iteration_bounds = array<i64: 3>, scalar_prefetch = 0 : i64, scratch_operands = 1 : i64, tpu.core_type = #tpu.core_type<tc>, window_params = [{transform_indices = @transform_0, window_bounds = array<i64: 8, 128>}, {transform_indices = @transform_1, window_bounds = array<i64: 8, 1>}, {pipeline_mode = #tpu.pipeline_mode<synchronous>, transform_indices = @transform_2, window_bounds = array<i64: 1, 2>}]} {
    %c0_i32 = arith.constant 0 : i32
    %0 = arith.cmpi eq, %arg0, %c0_i32 : i32
    %1 = arith.extui %0 : i1 to i32
    %c0_i32_0 = arith.constant 0 : i32
    %2 = arith.cmpi ne, %1, %c0_i32_0 : i32
    scf.if %2 {
      %c0_i32_15 = arith.constant 0 : i32
      %47 = vector.broadcast %c0_i32_15 : i32 to vector<1x2xi32>
      %c0_16 = arith.constant 0 : index
      %c0_17 = arith.constant 0 : index
      %48 = vector.load %arg4[%c0_16, %c0_17] : memref<1x2xi32, #tpu.memory_space<vmem>>, vector<1x2xi32>
      tpu.vector_store %arg4[%c0_16, %c0_17], %47 {strides = array<i32>} : memref<1x2xi32, #tpu.memory_space<vmem>>, vector<1x2xi32>,
    } else {
    }
    %c0 = arith.constant 0 : index
    %c0_1 = arith.constant 0 : index
    %3 = vector.load %arg1[%c0, %c0_1] : memref<8x128xf32, #tpu.memory_space<vmem>>, vector<8x128xf32>
    %c0_2 = arith.constant 0 : index
    %c0_3 = arith.constant 0 : index
    %4 = vector.load %arg2[%c0_2, %c0_3] : memref<8x1xi32, #tpu.memory_space<vmem>>, vector<8x1xi32>
    %5 = tpu.iota {dimensions = array<i32: 1>} : vector<8x128xi32>
    %6 = vector.broadcast %4 : vector<8x1xi32> to vector<8x128xi32>
    %7 = arith.cmpi eq, %5, %6 : vector<8x128xi32>
    %cst = arith.constant 0xFF800000 : f32
    %8 = vector.broadcast %cst : f32 to vector<8x128xf32>
    %9 = arith.select %7, %3, %8 : vector<8x128xi1>, vector<8x128xf32>
    %cst_4 = arith.constant dense<0xFF800000> : vector<8xf32>
    %10 = vector.multi_reduction <maximumf>, %9, %cst_4 [1] : vector<8x128xf32> to vector<8xf32>
    %11 = vector.shape_cast %10 : vector<8xf32> to vector<8x1xf32>
    %12 = vector.broadcast %11 : vector<8x1xf32> to vector<8x128xf32>
    %13 = arith.cmpf ogt, %3, %12 : vector<8x128xf32>
    %14 = arith.extui %13 : vector<8x128xi1> to vector<8x128xi32>
    %cst_5 = arith.constant dense<0> : vector<8xi32>
    %15 = vector.multi_reduction <add>, %14, %cst_5 [1] : vector<8x128xi32> to vector<8xi32>
    %16 = vector.shape_cast %15 : vector<8xi32> to vector<8x1xi32>
    %17 = tpu.iota {dimensions = array<i32: 0>} : vector<8x1xi32>
    %c8_i32 = arith.constant 8 : i32
    %18 = arith.muli %arg0, %c8_i32 : i32
    %19 = vector.broadcast %18 : i32 to vector<8x1xi32>
    %20 = arith.addi %19, %17 : vector<8x1xi32>
    %c24_i32 = arith.constant 24 : i32
    %21 = vector.broadcast %c24_i32 : i32 to vector<8x1xi32>
    %22 = arith.cmpi slt, %20, %21 : vector<8x1xi32>
    %23 = tpu.iota {dimensions = array<i32: 1>} : vector<1x2xi32>
    %c0_i32_6 = arith.constant 0 : i32
    %24 = vector.broadcast %c0_i32_6 : i32 to vector<1x2xi32>
    %c0_i32_7 = arith.constant 0 : i32
    %25 = vector.broadcast %c0_i32_7 : i32 to vector<1x2xi32>
    %26 = arith.cmpi eq, %23, %25 : vector<1x2xi32>
    %c1_i32 = arith.constant 1 : i32
    %27 = vector.broadcast %c1_i32 : i32 to vector<1x2xi32>
    %28 = arith.select %26, %27, %24 : vector<1x2xi1>, vector<1x2xi32>
    %c1_i32_8 = arith.constant 1 : i32
    %29 = vector.broadcast %c1_i32_8 : i32 to vector<1x2xi32>
    %30 = arith.cmpi eq, %23, %29 : vector<1x2xi32>
    %c5_i32 = arith.constant 5 : i32
    %31 = vector.broadcast %c5_i32 : i32 to vector<1x2xi32>
    %32 = arith.select %30, %31, %28 : vector<1x2xi1>, vector<1x2xi32>
    %33 = vector.broadcast %16 : vector<8x1xi32> to vector<8x2xi32>
    %34 = vector.broadcast %32 : vector<1x2xi32> to vector<8x2xi32>
    %35 = arith.cmpi slt, %33, %34 : vector<8x2xi32>
    %36 = vector.broadcast %22 : vector<8x1xi1> to vector<8x2xi1>
    %37 = arith.andi %35, %36 : vector<8x2xi1>
    %c0_9 = arith.constant 0 : index
    %c0_10 = arith.constant 0 : index
    %38 = vector.load %arg4[%c0_9, %c0_10] : memref<1x2xi32, #tpu.memory_space<vmem>>, vector<1x2xi32>
    %39 = arith.extui %37 : vector<8x2xi1> to vector<8x2xi32>
    %cst_11 = arith.constant dense<0> : vector<2xi32>
    %40 = vector.multi_reduction <add>, %39, %cst_11 [0] : vector<8x2xi32> to vector<2xi32>
    %41 = vector.shape_cast %40 : vector<2xi32> to vector<1x2xi32>
    %42 = arith.addi %38, %41 : vector<1x2xi32>
    %c0_12 = arith.constant 0 : index
    %c0_13 = arith.constant 0 : index
    %43 = vector.load %arg4[%c0_12, %c0_13] : memref<1x2xi32, #tpu.memory_space<vmem>>, vector<1x2xi32>
    tpu.vector_store %arg4[%c0_12, %c0_13], %42 {strides = array<i32>} : memref<1x2xi32, #tpu.memory_space<vmem>>, vector<1x2xi32>,
    %c2_i32 = arith.constant 2 : i32
    %44 = arith.cmpi eq, %arg0, %c2_i32 : i32
    %45 = arith.extui %44 : i1 to i32
    %c0_i32_14 = arith.constant 0 : i32
    %46 = arith.cmpi ne, %45, %c0_i32_14 : i32
    scf.if %46 {
      %c0_15 = arith.constant 0 : index
      %c0_16 = arith.constant 0 : index
      %47 = vector.load %arg4[%c0_15, %c0_16] : memref<1x2xi32, #tpu.memory_space<vmem>>, vector<1x2xi32>
      %48 = arith.sitofp %47 : vector<1x2xi32> to vector<1x2xf32>
      %cst_17 = arith.constant 0.0416666679 : f32
      %49 = vector.broadcast %cst_17 : f32 to vector<1x2xf32>
      %50 = arith.mulf %48, %49 : vector<1x2xf32>
      %c0_18 = arith.constant 0 : index
      %c0_19 = arith.constant 0 : index
      %51 = vector.load %arg3[%c0_18, %c0_19] : memref<1x2xf32, #tpu.memory_space<vmem>>, vector<1x2xf32>
      tpu.vector_store %arg3[%c0_18, %c0_19], %50 {strides = array<i32>} : memref<1x2xf32, #tpu.memory_space<vmem>>, vector<1x2xf32>,
    } else {
    }
    return
  }
  func.func @transform_0(%arg0: i32) -> (i32, i32) {
    %c0_i32 = arith.constant 0 : i32
    %c0_i32_0 = arith.constant 0 : i32
    return %arg0, %c0_i32 : i32, i32
  }
  func.func @transform_1(%arg0: i32) -> (i32, i32) {
    %c0_i32 = arith.constant 0 : i32
    %c0_i32_0 = arith.constant 0 : i32
    return %arg0, %c0_i32 : i32, i32
  }
  func.func @transform_2(%arg0: i32) -> (i32, i32) {
    %c0_i32 = arith.constant 0 : i32
    %c0_i32_0 = arith.constant 0 : i32
    %c0_i32_1 = arith.constant 0 : i32
    return %c0_i32, %c0_i32_0 : i32, i32
  }
}

</mosaic_0001>

<bundles_post_ra>
// kernel: tpu_custom_call.1
= control target key start
LH: loop header
LB: loop body
LE: loop exit
PB: predicated region body
PF: predicated region fallthrough
CT: control target
= control target key end

     0   :  { %7 = vsyncpa [#allocation4], 0  ;;  %s355_s9 = smov 0   ;;  %s402_s0 = inlined_call_operand.vmem [shape: f32[24,128], index: 0, kind: input, shape index: {}]   ;;  %s403_s1 = inlined_call_operand.vmem [shape: s32[24,1], index: 1, kind: input, shape index: {}]   ;;  %s404_s2 = inlined_call_operand.hbm [shape: f32[1,2], index: 2, kind: output, shape index: {}]  }
   0x1 LB: > { %s361_s10 = sadd.s32 4294967295, %s335_s9   ;;  %p271_p0 = scmp.ge.s32.totalorder %s335_s9, 1  ;;  %s335_s9 = sphi %s355_s9, %s13_s9  }
   0x2   : > { %p116_p1 = scmp.lt.s32.totalorder %s335_s9, 4 }
   0x4   : > { %p117_p2 = pnand %p271_p0, %p116_p1 }
   0x5   : > { %p136_p3 = scmp.lt.s32.totalorder (!%p117_p2), %s361_s10, 2  ;;  %p274_p4 = scmp.ne.s32.totalorder (!%p117_p2), %s361_s10, 0 }
   0x6   : > { %120 = sbr.rel (%p117_p2) target bundleno = 507 (0x1fb), region = 28 }
   0xd   : > { %s137_s11 = scalar_select %p136_p3, %s361_s10, 2 }
   0xe   : > { %147 = sbr.rel (%p274_p4) target bundleno = 21 (0x15), region = 32  ;;  %vm148_vm0 = vcmask (!%p274_p4), 8192   ;;  %v337_v0 = vmov (!%p274_p4), 0  }
   0xf   : > { %s272_s12 = sshll.u32 %s137_s11, 3  ;;  %149 = vst.msk [vmem:[#allocation2] sm:$0x1] (!%p274_p4), %vm148_vm0, %v337_v0 }
  0x10   : > { %s139_s15 = scalar_lea.vmem %s402_s0, %s272_s12  ;;  %s143_s18 = scalar_lea.vmem %s403_s1, %s272_s12 }
  0x15 PF: > { %v151_v1 = vld [vmem:[%s143_s18] sm:$0xff]  ;;  %v338_v2 = vmov 0   ;;  %v152_v3 = vlaneseq  ;;  %s275_s19 = sshll.u32 %s361_s10, 3  ;;  %vm191_vm6 = vcmask 15360   ;;  %vm200_vm9 = vcmask 8192   ;;  %p276_p5 = scmp.ne.s32.totalorder %s361_s10, 2 }
  0x16   : > { %298 = vset.pattern.permute.xlu0 %v338_v2  ;;  %v150_v5 = vld [vmem:[%s139_s15] sm:$0xff]  ;;  %v178_v16 = vstv %s275_s19 }
  0x17   : > { %155 = vperm.xlu0 %298, %v151_v1   ;;  %v153_v4 = vand.u32 127, %v152_v3  ;;  %v176_v14 = vshrl.u32 %v152_v3, 7  ;;  %v189_v32 = vld [vmem:[#allocation2] sm:$0x1] }
  0x19   : > { %vm181_vm3 = vcmp.eq.s32.totalorder %v153_v4, 0  ;;  %v179_v18 = vadd.s32 %v178_v16, %v176_v14  ;;  %vm183_vm4 = vcmp.eq.s32.totalorder %v153_v4, 1 }
  0x1a   : > { %v182_v19 = vsel %vm181_vm3, 1, %v338_v2 }
  0x1b   : > { %v184_v23 = vsel %vm183_vm4, 5, %v182_v19  ;;  %vm180_vm5 = vcmp.lt.s32.totalorder %v179_v18, 24 }
  0x96   : > { %v156_v6 = vpop.permute.xlu0 %155 }
  0x97   : > { %vm157_vm1 = vcmp.eq.s32.totalorder %v153_v4, %v156_v6 }
  0x98   : > { %v158_v7 = vsel %vm157_vm1, %v150_v5, -inf }
  0x99   : > { %159 = vmax.xlane.f32.xlu0 %v158_v7 }
 0x126   : > { %v160_v8 = vpop.xlane.xlu0 %159 }
 0x127   : > { %vm161_vm2 = vcmp.gt.f32.partialorder %v150_v5, %v160_v8 }
 0x128   : > { %v162_v9 = vsel %vm161_vm2, 1, %v338_v2 }
 0x129   : > { %v164_v10 = vshrl.u32 %v162_v9, 16  ;;  %v163_v12 = vand.u32 65535, %v162_v9 }
 0x12b   : > { %v166_v11 = vcvt.s32.f32 %v164_v10  ;;  %v165_v13 = vcvt.s32.f32 %v163_v12 }
 0x12d   : > { %169 = vadd.xlane.f32.xlu1 %v166_v11 }
 0x131   : > { %167 = vadd.xlane.f32.xlu1 %v165_v13 }
 0x1ba   : > { %v170_v15 = vpop.xlane.xlu1 %169 }
 0x1bb   : > { %v172_v17 = vcvt.f32.s32 %v170_v15 }
 0x1bd   : > { %v173_v21 = vshll.u32 %v172_v17, 16 }
 0x1be   : > { %v168_v20 = vpop.xlane.xlu1 %167 }
 0x1bf   : > { %v171_v22 = vcvt.f32.s32 %v168_v20 }
 0x1c1   : > { %v174_v24 = vadd.s32 %v173_v21, %v171_v22 }
 0x1c3   : > { %vm185_vm7 = vcmp.lt.s32.totalorder %v174_v24, %v184_v23 }
 0x1c4   : > { %vm188_vm8 = vmand %vm185_vm7, %vm180_vm5 }
 0x1c5   : > { %v190_v25 = vsel %vm188_vm8, 1, %v338_v2 }
 0x1c6   : > { %v192_v26 = vsel %vm191_vm6, %v190_v25, 0 }
 0x1c7   : > { %v193_v27 = vrot.slane %v192_v26, 4 }
 0x1c9   : > { %v194_v28 = vadd.s32 %v193_v27, %v192_v26 }
 0x1cb   : > { %v195_v29 = vrot.slane %v194_v28, 2 }
 0x1cd   : > { %v196_v30 = vadd.s32 %v195_v29, %v194_v28 }
 0x1cf   : > { %v197_v31 = vrot.slane %v196_v30, 1  ;;  %205 = sbr.rel (%p276_p5) target bundleno = 482 (0x1e2), region = 36 }
 0x1d1   : > { %v198_v33 = vadd.s32 %v197_v31, %v196_v30 }
 0x1d3   : > { %v199_v34 = vadd.s32 %v198_v33, %v189_v32 }
 0x1d5   : > { %201 = vst.msk [vmem:[#allocation2] sm:$0x1] %vm200_vm9, %v199_v34 }
 0x1dc   : > { %v206_v35 = vld [vmem:[#allocation2] sm:$0x1] }
 0x1dd   : > { %v207_v36 = vcvt.s32.f32 %v206_v35 }
 0x1df   : > { %v208_v37 = vmul.f32 0.041666668, %v207_v36 }
 0x1e1   : > { %209 = vst.msk [vmem:[#allocation3] sm:$0x1] %vm200_vm9, %v208_v37 }
 0x1e2 PF: > { %p285_p6 = scmp.eq.s32.totalorder %s361_s10, 2  ;;  %s339_s20 = smov [#allocation3]  }
 0x1e3   : > { %s217_s21 = sshll.u32 %s339_s20, 4  ;;  %s218_s21 = int_to_ptr.vmem [resolvable:$true] %s217_s21 }
 0x1e4   : > { %s299_s22 = scalar_lea.vmem %s218_s21, 16  ;;  %s305_s23 = scalar_lea.vmem %s218_s21, 32 }
 0x1e5   : > { %p300_p7 = scmp.ne.s32.totalorder %s218_s21, %s299_s22  ;;  %p306_p10 = scmp.lt.s32.totalorder %s218_s21, %s218_s21 }
 0x1e6   : > { %p307_p11 = scmp.lt.s32.totalorder %s305_s23, %s299_s22 }
 0x1e7   : > { %p301_p8 = pnand %p300_p7, %p285_p6 }
 0x1e8   : > { %p308_p12 = por %p307_p11, %p306_p10 }
 0x1e9   : > { %p302_p9 = pneg %p301_p8 }
 0x1eb   : > { %p309_p13 = pnand %p308_p12, %p302_p9 }
 0x1ed   : > { %312 = shalt.err (!%p309_p13)
}
 0x1ee   : > { %s313_s26 = scalar_lea.hbm %s404_s2, 16 }
 0x1ef   : > { %p314_p0 = scmp.ne.s32.totalorder %s404_s2, %s313_s26  ;;  %p319_p3 = scmp.lt.u32.totalorder %s313_s26, %s404_s2 }
 0x1f1   : > { %p315_p1 = pnand %p314_p0, %p285_p6 }
 0x1f3   : > { %p316_p2 = pneg %p315_p1 }
 0x1f5   : > { %p321_p4 = pnand %p319_p3, %p316_p2 }
 0x1f7   : > { %324 = shalt.err (!%p321_p4)
}
 0x1f8   : > { %282 = dma.vmem_to_hbm [thread:$0]  (%p285_p6), %s218_s21, 16, %s404_s2, [#allocation4]  }
 0x1f9   : > { %330 = dma.done.wait (%p285_p6), [#allocation4], 16  }
 0x1fa   : > { %332 = vsyncadd (%p285_p6), [#allocation4], 4294967280 }
 0x1fb PF: > { %s13_s9 = sadd.s32 1, %s335_s9  }
 0x1fc   : > { %p10_p5 = scmp.ge.s32.totalorder %s13_s9, 5  }
 0x1fe   :  { %12 = sbr.rel (!%p10_p5) target bundleno = 1 (0x1), region = 66 }
 0x205   :  { %230 = vsyncpa [#allocation4], 1 }
 0x206   :  { %232 = vsyncpa [#allocation4 + $0x1], 1 }

</bundles_post_ra>
